<compile_context>
chip_gen: v7x
topology: tpu7x:2x2x1
jax: 0.10.0
libtpu: 0.0.40
codegen_flags: <defaults>
</compile_context>

<pallas_src>
import jax
import jax.numpy as jnp
from jax.experimental import pallas as pl
from jax.experimental.pallas import tpu as pltpu


# ----------------------------------------------------------------------------
# Pallas kernel: dense noobj/obj confidence loss, grid = (batch, anchor).
# ----------------------------------------------------------------------------
def make_yolo_scale_kernel(grid_size, img_size, ignore_thresh):
    inv_gs = 1.0 / float(grid_size)
    inv_img = 1.0 / float(img_size)

    def kernel(anch_ref, pred_ref, gxy_ref, tbox_ref, tvalid_ref, objm_ref,
               out_ref):
        a = pl.program_id(1)
        aw = anch_ref[a, 0] * inv_img            # scalar anchor w (normalized)
        ah = anch_ref[a, 1] * inv_img            # scalar anchor h (normalized)

        p = pred_ref[...]                        # (8, L) head channels
        obj = objm_ref[...]                      # (1, L) float {0,1}

        sig_xy = jax.nn.sigmoid(p[0:2, :])       # (2, L)
        conf = jax.nn.sigmoid(p[4:5, :])         # (1, L)

        # Decode predicted boxes (normalized to image size), center-xywh form.
        bxy = (sig_xy + gxy_ref[...]) * inv_gs   # (2, L)
        bw = jnp.exp(p[2:3, :]) * aw             # (1, L)
        bh = jnp.exp(p[3:4, :]) * ah             # (1, L)

        px1 = bxy[0:1, :] - 0.5 * bw
        px2 = bxy[0:1, :] + 0.5 * bw
        py1 = bxy[1:2, :] - 0.5 * bh
        py2 = bxy[1:2, :] + 0.5 * bh
        parea = bw * bh

        tb = tbox_ref[...]                       # (T, 4) target boxes (x,y,w,h)
        tval = tvalid_ref[...]                   # (T, 1) validity (cumulative)
        tx1 = tb[:, 0:1] - 0.5 * tb[:, 2:3]
        tx2 = tb[:, 0:1] + 0.5 * tb[:, 2:3]
        ty1 = tb[:, 1:2] - 0.5 * tb[:, 3:4]
        ty2 = tb[:, 1:2] + 0.5 * tb[:, 3:4]
        tarea = tb[:, 2:3] * tb[:, 3:4]

        # IoU of every predicted box vs every (valid) target box: (T, L)
        iw = jnp.maximum(jnp.minimum(px2, tx2) - jnp.maximum(px1, tx1), 0.0)
        ih = jnp.maximum(jnp.minimum(py2, ty2) - jnp.maximum(py1, ty1), 0.0)
        inter = iw * ih
        iou = inter * pl.reciprocal(parea + tarea - inter + 1e-16, approx=True)
        iou = jnp.where(tval > 0.0, iou, -1.0)
        max_iou = jnp.max(iou, axis=0, keepdims=True)            # (1, L)

        noobj_f = jnp.logical_and(max_iou <= ignore_thresh,
                                  obj < 0.5).astype(jnp.float32)

        # Per-lane partial: noobj conf^2 + obj (conf - 1)^2 (sum happens in XLA).
        out_ref[...] = noobj_f * conf * conf + obj * (conf - 1.0) ** 2

    return kernel


# ----------------------------------------------------------------------------
# Vectorized plain-JAX glue: anchor matching + sparse class/coords losses.
# ----------------------------------------------------------------------------
def sparse_scale_terms(pred_r, targets, anchors_total, idx, *, B, C, gs,
                       img_size):
    batch, T, _ = targets.shape
    L = gs * gs
    Nb = B * L
    A = anchors_total.shape[0]

    tcls = jnp.clip(targets[:, :, 0].astype(jnp.int32), 0, C - 1)   # (batch, T)
    tx = targets[:, :, 1]
    ty = targets[:, :, 2]
    tw = targets[:, :, 3]
    th = targets[:, :, 4]

    # Reference breaks at the first target with x == 0 -> prefix validity.
    valid = jnp.cumprod((tx != 0).astype(jnp.float32), axis=1) > 0.0

    # Anchor matching: IoU of (0,0,tw,th) vs all anchors (normalized).
    an = anchors_total / img_size                                   # (A, 2)
    inter = (jnp.minimum(tw[..., None], an[:, 0]) *
             jnp.minimum(th[..., None], an[:, 1]))                  # (batch,T,A)
    union = tw[..., None] * th[..., None] + an[:, 0] * an[:, 1] - inter + 1e-16
    best = jnp.argmax(inter / union, axis=-1).astype(jnp.int32)     # (batch, T)

    in_scale = (best >= idx * B) & (best < (idx + 1) * B)
    write = valid & in_scale
    # TODO(synk): reproduces the reference's `index - 3` local-anchor mapping,
    # which is only well-defined for the first two detection scales.
    local = jnp.where(best < 3, best, best - 3)

    gi = (tx * gs).astype(jnp.int32)
    gj = (ty * gs).astype(jnp.int32)
    cell = gj * gs + gi                                             # spatial idx
    flat = local * L + cell                                         # (batch, T)
    flat_w = jnp.where(write, flat, Nb)                             # OOB -> drop

    b_idx = jnp.arange(batch, dtype=jnp.int32)[:, None]
    obj_mask = jnp.zeros((batch, Nb), jnp.float32).at[b_idx, flat_w].set(
        1.0, mode='drop')

    # Last-writer-wins dedup (matches the reference's in-place overwrites).
    t_lt = jnp.arange(T)[:, None] < jnp.arange(T)[None, :]          # t < t'
    same_cell = flat[:, :, None] == flat[:, None, :]
    later_writer = t_lt[None, :, :] & write[:, None, :]
    keep_cell = write & ~jnp.any(same_cell & later_writer, axis=2)
    same_pair = same_cell & (tcls[:, :, None] == tcls[:, None, :])
    keep_pair = write & ~jnp.any(same_pair & later_writer, axis=2)

    # Gather raw predictions at the (<= batch*T) matched cells.
    lc = jnp.clip(local, 0, B - 1)
    cc = jnp.clip(cell, 0, L - 1)
    pred_cell = pred_r[b_idx, lc, :, cc]                            # (batch,T,C+5)

    px = jax.nn.sigmoid(pred_cell[..., 0])
    py = jax.nn.sigmoid(pred_cell[..., 1])
    pw = pred_cell[..., 2]
    ph = pred_cell[..., 3]
    pcls = jax.nn.sigmoid(pred_cell[..., 5:])                       # (batch,T,C)

    keep_cell_f = keep_cell.astype(jnp.float32)
    keep_pair_f = keep_pair.astype(jnp.float32)

    # Class loss: sum over obj cells of ||sigmoid(cls) - multi_hot_target||^2,
    # expanded so each distinct (cell, class) write is counted exactly once.
    sig_at_cls = jnp.take_along_axis(pcls, tcls[..., None], axis=-1)[..., 0]
    loss_class = (jnp.sum(keep_cell_f[..., None] * pcls * pcls)
                  - 2.0 * jnp.sum(keep_pair_f * sig_at_cls)
                  + jnp.sum(keep_pair_f))

    # Coords loss (last writer per cell wins, as in the reference).
    bb = jnp.clip(best, 0, A - 1)
    aw = anchors_total[bb, 0]
    ah = anchors_total[bb, 1]
    ex = tx * gs - gi.astype(jnp.float32)
    ey = ty * gs - gj.astype(jnp.float32)
    tw_s = jnp.where(write, tw, 1.0)                                # guard log()
    th_s = jnp.where(write, th, 1.0)
    ew = jnp.log(tw_s * img_size / aw)
    eh = jnp.log(th_s * img_size / ah)
    sc = 2.0 - tw * th
    d = ((px - ex) ** 2 + (py - ey) ** 2
         + (pw - ew) ** 2 + (ph - eh) ** 2) * sc * sc
    loss_coords = jnp.sum(keep_cell_f * d)

    return obj_mask, loss_class, loss_coords


# ----------------------------------------------------------------------------
# Per-scale wrapper around pallas_call.
# ----------------------------------------------------------------------------
def yolo_scale_loss(pred, targets, anchors, idx, *, B, C, img_size,
                    ignore_thresh=0.7):
    batch = pred.shape[0]
    gs = pred.shape[2]
    NC = C + 5
    L = gs * gs
    T = targets.shape[1]
    anchors_total = anchors.reshape(-1, 2).astype(jnp.float32)

    # Free contiguous reshape: NCHW (batch, B*(C+5), gs, gs) -> (batch, B, C+5, L)
    pred_r = pred.reshape(batch, B, NC, L).astype(jnp.float32)

    # Sparse per-target terms + dense obj mask (vectorized plain-JAX glue).
    obj_mask, loss_class, loss_coords = sparse_scale_terms(
        pred_r, targets.astype(jnp.float32), anchors_total, idx,
        B=B, C=C, gs=gs, img_size=float(img_size))
    obj_mask_r = obj_mask.reshape(batch, B, 1, L)

    # Grid x/y offsets shared by all (batch, anchor) steps: (2, L).
    lane = jnp.arange(L, dtype=jnp.int32)
    gxy = jnp.stack([(lane % gs).astype(jnp.float32),
                     (lane // gs).astype(jnp.float32)], axis=0)

    tbox = targets[:, :, 1:5].astype(jnp.float32)                   # (batch,T,4)
    tvalid = jnp.cumprod((targets[:, :, 1] != 0).astype(jnp.float32),
                         axis=1)[:, :, None]                        # (batch,T,1)

    anchors_scale = anchors[idx].astype(jnp.float32)                # (B, 2) SMEM

    head_rows = 8 if NC >= 8 else NC                                # aligned slice
    kernel = make_yolo_scale_kernel(gs, float(img_size), ignore_thresh)

    out = pl.pallas_call(
        kernel,
        grid=(batch, B),
        in_specs=[
            pl.BlockSpec(memory_space=pltpu.MemorySpace.SMEM),      # anchors (B,2)
            pl.BlockSpec((None, None, head_rows, L),
                         lambda b, a: (b, a, 0, 0)),                # pred head
            pl.BlockSpec((2, L), lambda b, a: (0, 0)),              # grid offsets
            pl.BlockSpec((None, T, 4), lambda b, a: (b, 0, 0)),     # target boxes
            pl.BlockSpec((None, T, 1), lambda b, a: (b, 0, 0)),     # target valid
            pl.BlockSpec((None, None, 1, L),
                         lambda b, a: (b, a, 0, 0)),                # obj mask
        ],
        out_specs=pl.BlockSpec((None, None, 1, L), lambda b, a: (b, a, 0, 0)),
        out_shape=jax.ShapeDtypeStruct((batch, B, 1, L), jnp.float32),
        compiler_params=pltpu.CompilerParams(
            dimension_semantics=("parallel", "parallel")),
    )(anchors_scale, pred_r, gxy, tbox, tvalid, obj_mask_r)

    loss_dense = jnp.sum(out)           # noobj + obj confidence terms
    return (loss_dense + loss_class + loss_coords) / batch


def yolov3_loss(preds, targets, img_size, anchors, *, B=3, C=20):
    loss = jnp.float32(0.0)
    for idx, pred in enumerate(preds):
        loss = loss + yolo_scale_loss(pred, targets, anchors, idx,
                                      B=B, C=C, img_size=img_size)
    return loss


# ----------------------------------------------------------------------------
if __name__ == "__main__":
    key = jax.random.PRNGKey(0)
    B_anch, C = 3, 20
    batch = 2
    img_size = 64.0
    T = 4
    grid_sizes = [8, 4]          # two scales -> anchor indices 0..5

    # deterministic "parameters": YOLOv3-style anchors for the two scales
    anchors = jnp.asarray(
        [[10., 13.], [16., 30.], [33., 23.],
         [30., 61.], [62., 45.], [59., 119.]],
        dtype=jnp.float32).reshape(-1, B_anch, 2)      # (2, 3, 2)

    # predictions (raw conv outputs, NCHW)
    preds = []
    for s, gs in enumerate(grid_sizes):
        kk = jax.random.fold_in(key, s)
        preds.append(0.5 * jax.random.normal(
            kk, (batch, B_anch * (C + 5), gs, gs), dtype=jnp.float32))

    # targets: (batch, T, 5) = [class, x, y, w, h]; zero-padded tail = invalid
    k1, k2, k3, k4 = jax.random.split(jax.random.fold_in(key, 100), 4)
    tx = jax.random.uniform(k1, (batch, T), minval=0.05, maxval=0.95)
    ty = jax.random.uniform(k2, (batch, T), minval=0.05, maxval=0.95)
    twh = jax.random.uniform(k3, (batch, T, 2), minval=0.05, maxval=0.5)
    tcls = jax.random.randint(k4, (batch, T), 0, C).astype(jnp.float32)
    targets = jnp.concatenate(
        [tcls[..., None], tx[..., None], ty[..., None], twh], axis=-1)
    valid = jnp.asarray([[1, 1, 0, 0], [1, 1, 1, 0]], jnp.float32)[..., None]
    targets = (targets * valid).astype(jnp.float32)

    loss_fn = jax.jit(lambda p, t, a: yolov3_loss(p, t, img_size, a,
                                                  B=B_anch, C=C))
    loss = loss_fn(preds, targets, anchors)
    loss = jax.block_until_ready(loss)
    assert bool(jnp.isfinite(loss)), f"non-finite loss: {loss}"
    print("KERNEL_OK")
</pallas_src>

<mosaic_0001>
module attributes {stable_mosaic.version = 11 : i64} {
  func.func @kernel(%arg0: i32, %arg1: i32, %arg2: memref<3x2xf32, #tpu.memory_space<smem>>, %arg3: memref<1x1x8x16xf32, #tpu.memory_space<vmem>>, %arg4: memref<2x16xf32, #tpu.memory_space<vmem>>, %arg5: memref<1x4x4xf32, #tpu.memory_space<vmem>>, %arg6: memref<1x4x1xf32, #tpu.memory_space<vmem>>, %arg7: memref<1x1x1x16xf32, #tpu.memory_space<vmem>>, %arg8: memref<1x1x1x16xf32, #tpu.memory_space<vmem>>) attributes {dimension_semantics = [#tpu.dimension_semantics<parallel>, #tpu.dimension_semantics<parallel>], iteration_bounds = array<i64: 2, 3>, scalar_prefetch = 0 : i64, scratch_operands = 0 : i64, tpu.core_type = #tpu.core_type<tc>, window_params = [{transform_indices = @transform_0, window_bounds = array<i64: 3, 2>}, {transform_indices = @transform_1, window_bounds = array<i64: 1, 1, 8, 16>}, {pipeline_mode = #tpu.pipeline_mode<synchronous>, transform_indices = @transform_2, window_bounds = array<i64: 2, 16>}, {transform_indices = @transform_3, window_bounds = array<i64: 1, 4, 4>}, {transform_indices = @transform_4, window_bounds = array<i64: 1, 4, 1>}, {transform_indices = @transform_5, window_bounds = array<i64: 1, 1, 1, 16>}, {transform_indices = @transform_6, window_bounds = array<i64: 1, 1, 1, 16>}]} {
    %0 = arith.index_cast %arg1 : i32 to index
    %c0 = arith.constant 0 : index
    %1 = memref.load %arg2[%0, %c0] : memref<3x2xf32, #tpu.memory_space<smem>>
    %cst = arith.constant 1.562500e-02 : f32
    %2 = arith.mulf %1, %cst : f32
    %3 = arith.index_cast %arg1 : i32 to index
    %c1 = arith.constant 1 : index
    %4 = memref.load %arg2[%3, %c1] : memref<3x2xf32, #tpu.memory_space<smem>>
    %cst_0 = arith.constant 1.562500e-02 : f32
    %5 = arith.mulf %4, %cst_0 : f32
    %c0_1 = arith.constant 0 : index
    %c0_2 = arith.constant 0 : index
    %c0_3 = arith.constant 0 : index
    %c0_4 = arith.constant 0 : index
    %6 = vector.load %arg3[%c0_1, %c0_2, %c0_3, %c0_4] : memref<1x1x8x16xf32, #tpu.memory_space<vmem>>, vector<1x1x8x16xf32>
    %7 = vector.shape_cast %6 : vector<1x1x8x16xf32> to vector<8x16xf32>
    %c0_5 = arith.constant 0 : index
    %c0_6 = arith.constant 0 : index
    %c0_7 = arith.constant 0 : index
    %c0_8 = arith.constant 0 : index
    %8 = vector.load %arg7[%c0_5, %c0_6, %c0_7, %c0_8] : memref<1x1x1x16xf32, #tpu.memory_space<vmem>>, vector<1x1x1x16xf32>
    %9 = vector.shape_cast %8 : vector<1x1x1x16xf32> to vector<1x16xf32>
    %10 = vector.extract_strided_slice %7 {offsets = [0, 0], sizes = [2, 16], strides = [1, 1]} : vector<8x16xf32> to vector<2x16xf32>
    %11 = arith.negf %10 : vector<2x16xf32>
    %12 = math.exp %11 : vector<2x16xf32>
    %cst_9 = arith.constant 1.000000e+00 : f32
    %13 = vector.broadcast %cst_9 : f32 to vector<2x16xf32>
    %14 = arith.addf %13, %12 : vector<2x16xf32>
    %15 = arith.divf %13, %14 : vector<2x16xf32>
    %16 = vector.extract_strided_slice %7 {offsets = [4, 0], sizes = [1, 16], strides = [1, 1]} : vector<8x16xf32> to vector<1x16xf32>
    %17 = arith.negf %16 : vector<1x16xf32>
    %18 = math.exp %17 : vector<1x16xf32>
    %cst_10 = arith.constant 1.000000e+00 : f32
    %19 = vector.broadcast %cst_10 : f32 to vector<1x16xf32>
    %20 = arith.addf %19, %18 : vector<1x16xf32>
    %21 = arith.divf %19, %20 : vector<1x16xf32>
    %c0_11 = arith.constant 0 : index
    %c0_12 = arith.constant 0 : index
    %22 = vector.load %arg4[%c0_11, %c0_12] : memref<2x16xf32, #tpu.memory_space<vmem>>, vector<2x16xf32>
    %23 = arith.addf %15, %22 : vector<2x16xf32>
    %cst_13 = arith.constant 2.500000e-01 : f32
    %24 = vector.broadcast %cst_13 : f32 to vector<2x16xf32>
    %25 = arith.mulf %23, %24 : vector<2x16xf32>
    %26 = vector.extract_strided_slice %7 {offsets = [2, 0], sizes = [1, 16], strides = [1, 1]} : vector<8x16xf32> to vector<1x16xf32>
    %27 = math.exp %26 : vector<1x16xf32>
    %28 = vector.broadcast %2 : f32 to vector<1x16xf32>
    %29 = arith.mulf %27, %28 : vector<1x16xf32>
    %30 = vector.extract_strided_slice %7 {offsets = [3, 0], sizes = [1, 16], strides = [1, 1]} : vector<8x16xf32> to vector<1x16xf32>
    %31 = math.exp %30 : vector<1x16xf32>
    %32 = vector.broadcast %5 : f32 to vector<1x16xf32>
    %33 = arith.mulf %31, %32 : vector<1x16xf32>
    %34 = vector.extract_strided_slice %25 {offsets = [0, 0], sizes = [1, 16], strides = [1, 1]} : vector<2x16xf32> to vector<1x16xf32>
    %cst_14 = arith.constant 5.000000e-01 : f32
    %35 = vector.broadcast %cst_14 : f32 to vector<1x16xf32>
    %36 = arith.mulf %35, %29 : vector<1x16xf32>
    %37 = arith.subf %34, %36 : vector<1x16xf32>
    %38 = vector.extract_strided_slice %25 {offsets = [0, 0], sizes = [1, 16], strides = [1, 1]} : vector<2x16xf32> to vector<1x16xf32>
    %cst_15 = arith.constant 5.000000e-01 : f32
    %39 = vector.broadcast %cst_15 : f32 to vector<1x16xf32>
    %40 = arith.mulf %39, %29 : vector<1x16xf32>
    %41 = arith.addf %38, %40 : vector<1x16xf32>
    %42 = vector.extract_strided_slice %25 {offsets = [1, 0], sizes = [1, 16], strides = [1, 1]} : vector<2x16xf32> to vector<1x16xf32>
    %cst_16 = arith.constant 5.000000e-01 : f32
    %43 = vector.broadcast %cst_16 : f32 to vector<1x16xf32>
    %44 = arith.mulf %43, %33 : vector<1x16xf32>
    %45 = arith.subf %42, %44 : vector<1x16xf32>
    %46 = vector.extract_strided_slice %25 {offsets = [1, 0], sizes = [1, 16], strides = [1, 1]} : vector<2x16xf32> to vector<1x16xf32>
    %cst_17 = arith.constant 5.000000e-01 : f32
    %47 = vector.broadcast %cst_17 : f32 to vector<1x16xf32>
    %48 = arith.mulf %47, %33 : vector<1x16xf32>
    %49 = arith.addf %46, %48 : vector<1x16xf32>
    %50 = arith.mulf %29, %33 : vector<1x16xf32>
    %c0_18 = arith.constant 0 : index
    %c0_19 = arith.constant 0 : index
    %c0_20 = arith.constant 0 : index
    %51 = vector.load %arg5[%c0_18, %c0_19, %c0_20] : memref<1x4x4xf32, #tpu.memory_space<vmem>>, vector<1x4x4xf32>
    %52 = vector.shape_cast %51 : vector<1x4x4xf32> to vector<4x4xf32>
    %c0_21 = arith.constant 0 : index
    %c0_22 = arith.constant 0 : index
    %c0_23 = arith.constant 0 : index
    %53 = vector.load %arg6[%c0_21, %c0_22, %c0_23] : memref<1x4x1xf32, #tpu.memory_space<vmem>>, vector<1x4x1xf32>
    %54 = vector.shape_cast %53 : vector<1x4x1xf32> to vector<4x1xf32>
    %55 = vector.extract_strided_slice %52 {offsets = [0, 0], sizes = [4, 1], strides = [1, 1]} : vector<4x4xf32> to vector<4x1xf32>
    %56 = vector.extract_strided_slice %52 {offsets = [0, 2], sizes = [4, 1], strides = [1, 1]} : vector<4x4xf32> to vector<4x1xf32>
    %cst_24 = arith.constant 5.000000e-01 : f32
    %57 = vector.broadcast %cst_24 : f32 to vector<4x1xf32>
    %58 = arith.mulf %57, %56 : vector<4x1xf32>
    %59 = arith.subf %55, %58 : vector<4x1xf32>
    %60 = vector.extract_strided_slice %52 {offsets = [0, 0], sizes = [4, 1], strides = [1, 1]} : vector<4x4xf32> to vector<4x1xf32>
    %61 = vector.extract_strided_slice %52 {offsets = [0, 2], sizes = [4, 1], strides = [1, 1]} : vector<4x4xf32> to vector<4x1xf32>
    %cst_25 = arith.constant 5.000000e-01 : f32
    %62 = vector.broadcast %cst_25 : f32 to vector<4x1xf32>
    %63 = arith.mulf %62, %61 : vector<4x1xf32>
    %64 = arith.addf %60, %63 : vector<4x1xf32>
    %65 = vector.extract_strided_slice %52 {offsets = [0, 1], sizes = [4, 1], strides = [1, 1]} : vector<4x4xf32> to vector<4x1xf32>
    %66 = vector.extract_strided_slice %52 {offsets = [0, 3], sizes = [4, 1], strides = [1, 1]} : vector<4x4xf32> to vector<4x1xf32>
    %cst_26 = arith.constant 5.000000e-01 : f32
    %67 = vector.broadcast %cst_26 : f32 to vector<4x1xf32>
    %68 = arith.mulf %67, %66 : vector<4x1xf32>
    %69 = arith.subf %65, %68 : vector<4x1xf32>
    %70 = vector.extract_strided_slice %52 {offsets = [0, 1], sizes = [4, 1], strides = [1, 1]} : vector<4x4xf32> to vector<4x1xf32>
    %71 = vector.extract_strided_slice %52 {offsets = [0, 3], sizes = [4, 1], strides = [1, 1]} : vector<4x4xf32> to vector<4x1xf32>
    %cst_27 = arith.constant 5.000000e-01 : f32
    %72 = vector.broadcast %cst_27 : f32 to vector<4x1xf32>
    %73 = arith.mulf %72, %71 : vector<4x1xf32>
    %74 = arith.addf %70, %73 : vector<4x1xf32>
    %75 = vector.extract_strided_slice %52 {offsets = [0, 2], sizes = [4, 1], strides = [1, 1]} : vector<4x4xf32> to vector<4x1xf32>
    %76 = vector.extract_strided_slice %52 {offsets = [0, 3], sizes = [4, 1], strides = [1, 1]} : vector<4x4xf32> to vector<4x1xf32>
    %77 = arith.mulf %75, %76 : vector<4x1xf32>
    %78 = vector.broadcast %41 : vector<1x16xf32> to vector<4x16xf32>
    %79 = vector.broadcast %64 : vector<4x1xf32> to vector<4x16xf32>
    %80 = arith.minimumf %78, %79 : vector<4x16xf32>
    %81 = vector.broadcast %37 : vector<1x16xf32> to vector<4x16xf32>
    %82 = vector.broadcast %59 : vector<4x1xf32> to vector<4x16xf32>
    %83 = arith.maximumf %81, %82 : vector<4x16xf32>
    %84 = arith.subf %80, %83 : vector<4x16xf32>
    %cst_28 = arith.constant 0.000000e+00 : f32
    %85 = vector.broadcast %cst_28 : f32 to vector<4x16xf32>
    %86 = arith.maximumf %84, %85 : vector<4x16xf32>
    %87 = vector.broadcast %49 : vector<1x16xf32> to vector<4x16xf32>
    %88 = vector.broadcast %74 : vector<4x1xf32> to vector<4x16xf32>
    %89 = arith.minimumf %87, %88 : vector<4x16xf32>
    %90 = vector.broadcast %45 : vector<1x16xf32> to vector<4x16xf32>
    %91 = vector.broadcast %69 : vector<4x1xf32> to vector<4x16xf32>
    %92 = arith.maximumf %90, %91 : vector<4x16xf32>
    %93 = arith.subf %89, %92 : vector<4x16xf32>
    %cst_29 = arith.constant 0.000000e+00 : f32
    %94 = vector.broadcast %cst_29 : f32 to vector<4x16xf32>
    %95 = arith.maximumf %93, %94 : vector<4x16xf32>
    %96 = arith.mulf %86, %95 : vector<4x16xf32>
    %97 = vector.broadcast %50 : vector<1x16xf32> to vector<4x16xf32>
    %98 = vector.broadcast %77 : vector<4x1xf32> to vector<4x16xf32>
    %99 = arith.addf %97, %98 : vector<4x16xf32>
    %100 = arith.subf %99, %96 : vector<4x16xf32>
    %cst_30 = arith.constant 1.000000e-16 : f32
    %101 = vector.broadcast %cst_30 : f32 to vector<4x16xf32>
    %102 = arith.addf %100, %101 : vector<4x16xf32>
    %103 = tpu.reciprocal %102 {approx = true} : vector<4x16xf32> -> vector<4x16xf32>
    %104 = arith.mulf %96, %103 : vector<4x16xf32>
    %cst_31 = arith.constant 0.000000e+00 : f32
    %105 = vector.broadcast %cst_31 : f32 to vector<4x1xf32>
    %106 = arith.cmpf ogt, %54, %105 : vector<4x1xf32>
    %cst_32 = arith.constant -1.000000e+00 : f32
    %107 = vector.shape_cast %106 : vector<4x1xi1> to vector<4x1xi1>
    %108 = vector.broadcast %107 : vector<4x1xi1> to vector<4x16xi1>
    %109 = vector.broadcast %cst_32 : f32 to vector<4x16xf32>
    %110 = arith.select %108, %104, %109 : vector<4x16xi1>, vector<4x16xf32>
    %cst_33 = arith.constant dense<0xFF800000> : vector<16xf32>
    %111 = vector.multi_reduction <maximumf>, %110, %cst_33 [0] : vector<4x16xf32> to vector<16xf32>
    %112 = vector.shape_cast %111 : vector<16xf32> to vector<1x16xf32>
    %cst_34 = arith.constant 0.699999988 : f32
    %113 = vector.broadcast %cst_34 : f32 to vector<1x16xf32>
    %114 = arith.cmpf ole, %112, %113 : vector<1x16xf32>
    %cst_35 = arith.constant 5.000000e-01 : f32
    %115 = vector.broadcast %cst_35 : f32 to vector<1x16xf32>
    %116 = arith.cmpf olt, %9, %115 : vector<1x16xf32>
    %117 = arith.andi %114, %116 : vector<1x16xi1>
    %118 = arith.extui %117 : vector<1x16xi1> to vector<1x16xi32>
    %119 = arith.sitofp %118 : vector<1x16xi32> to vector<1x16xf32>
    %120 = arith.mulf %119, %21 : vector<1x16xf32>
    %121 = arith.mulf %120, %21 : vector<1x16xf32>
    %cst_36 = arith.constant 1.000000e+00 : f32
    %122 = vector.broadcast %cst_36 : f32 to vector<1x16xf32>
    %123 = arith.subf %21, %122 : vector<1x16xf32>
    %124 = arith.mulf %123, %123 : vector<1x16xf32>
    %125 = arith.mulf %9, %124 : vector<1x16xf32>
    %126 = arith.addf %121, %125 : vector<1x16xf32>
    %c0_37 = arith.constant 0 : index
    %c0_38 = arith.constant 0 : index
    %c0_39 = arith.constant 0 : index
    %c0_40 = arith.constant 0 : index
    %127 = vector.load %arg8[%c0_37, %c0_38, %c0_39, %c0_40] : memref<1x1x1x16xf32, #tpu.memory_space<vmem>>, vector<1x1x1x16xf32>
    %128 = vector.shape_cast %127 : vector<1x1x1x16xf32> to vector<1x16xf32>
    %129 = vector.shape_cast %126 : vector<1x16xf32> to vector<1x1x1x16xf32>
    tpu.vector_store %arg8[%c0_37, %c0_38, %c0_39, %c0_40], %129 {strides = array<i32>} : memref<1x1x1x16xf32, #tpu.memory_space<vmem>>, vector<1x1x1x16xf32>,
    return
  }
  func.func @transform_0(%arg0: i32, %arg1: i32) -> (i32, i32) {
    %c0_i32 = arith.constant 0 : i32
    %c0_i32_0 = arith.constant 0 : i32
    %c0_i32_1 = arith.constant 0 : i32
    return %c0_i32, %c0_i32_0 : i32, i32
  }
  func.func @transform_1(%arg0: i32, %arg1: i32) -> (i32, i32, i32, i32) {
    %c0_i32 = arith.constant 0 : i32
    %c0_i32_0 = arith.constant 0 : i32
    %c0_i32_1 = arith.constant 0 : i32
    return %arg0, %arg1, %c0_i32, %c0_i32_0 : i32, i32, i32, i32
  }
  func.func @transform_2(%arg0: i32, %arg1: i32) -> (i32, i32) {
    %c0_i32 = arith.constant 0 : i32
    %c0_i32_0 = arith.constant 0 : i32
    %c0_i32_1 = arith.constant 0 : i32
    return %c0_i32, %c0_i32_0 : i32, i32
  }
  func.func @transform_3(%arg0: i32, %arg1: i32) -> (i32, i32, i32) {
    %c0_i32 = arith.constant 0 : i32
    %c0_i32_0 = arith.constant 0 : i32
    %c0_i32_1 = arith.constant 0 : i32
    return %arg0, %c0_i32, %c0_i32_0 : i32, i32, i32
  }
  func.func @transform_4(%arg0: i32, %arg1: i32) -> (i32, i32, i32) {
    %c0_i32 = arith.constant 0 : i32
    %c0_i32_0 = arith.constant 0 : i32
    %c0_i32_1 = arith.constant 0 : i32
    return %arg0, %c0_i32, %c0_i32_0 : i32, i32, i32
  }
  func.func @transform_5(%arg0: i32, %arg1: i32) -> (i32, i32, i32, i32) {
    %c0_i32 = arith.constant 0 : i32
    %c0_i32_0 = arith.constant 0 : i32
    %c0_i32_1 = arith.constant 0 : i32
    return %arg0, %arg1, %c0_i32, %c0_i32_0 : i32, i32, i32, i32
  }
  func.func @transform_6(%arg0: i32, %arg1: i32) -> (i32, i32, i32, i32) {
    %c0_i32 = arith.constant 0 : i32
    %c0_i32_0 = arith.constant 0 : i32
    %c0_i32_1 = arith.constant 0 : i32
    return %arg0, %arg1, %c0_i32, %c0_i32_0 : i32, i32, i32, i32
  }
}

module attributes {stable_mosaic.version = 11 : i64} {
  func.func @kernel(%arg0: i32, %arg1: i32, %arg2: memref<3x2xf32, #tpu.memory_space<smem>>, %arg3: memref<1x1x8x64xf32, #tpu.memory_space<vmem>>, %arg4: memref<2x64xf32, #tpu.memory_space<vmem>>, %arg5: memref<1x4x4xf32, #tpu.memory_space<vmem>>, %arg6: memref<1x4x1xf32, #tpu.memory_space<vmem>>, %arg7: memref<1x1x1x64xf32, #tpu.memory_space<vmem>>, %arg8: memref<1x1x1x64xf32, #tpu.memory_space<vmem>>) attributes {dimension_semantics = [#tpu.dimension_semantics<parallel>, #tpu.dimension_semantics<parallel>], iteration_bounds = array<i64: 2, 3>, scalar_prefetch = 0 : i64, scratch_operands = 0 : i64, tpu.core_type = #tpu.core_type<tc>, window_params = [{transform_indices = @transform_0, window_bounds = array<i64: 3, 2>}, {transform_indices = @transform_1, window_bounds = array<i64: 1, 1, 8, 64>}, {pipeline_mode = #tpu.pipeline_mode<synchronous>, transform_indices = @transform_2, window_bounds = array<i64: 2, 64>}, {transform_indices = @transform_3, window_bounds = array<i64: 1, 4, 4>}, {transform_indices = @transform_4, window_bounds = array<i64: 1, 4, 1>}, {transform_indices = @transform_5, window_bounds = array<i64: 1, 1, 1, 64>}, {transform_indices = @transform_6, window_bounds = array<i64: 1, 1, 1, 64>}]} {
    %0 = arith.index_cast %arg1 : i32 to index
    %c0 = arith.constant 0 : index
    %1 = memref.load %arg2[%0, %c0] : memref<3x2xf32, #tpu.memory_space<smem>>
    %cst = arith.constant 1.562500e-02 : f32
    %2 = arith.mulf %1, %cst : f32
    %3 = arith.index_cast %arg1 : i32 to index
    %c1 = arith.constant 1 : index
    %4 = memref.load %arg2[%3, %c1] : memref<3x2xf32, #tpu.memory_space<smem>>
    %cst_0 = arith.constant 1.562500e-02 : f32
    %5 = arith.mulf %4, %cst_0 : f32
    %c0_1 = arith.constant 0 : index
    %c0_2 = arith.constant 0 : index
    %c0_3 = arith.constant 0 : index
    %c0_4 = arith.constant 0 : index
    %6 = vector.load %arg3[%c0_1, %c0_2, %c0_3, %c0_4] : memref<1x1x8x64xf32, #tpu.memory_space<vmem>>, vector<1x1x8x64xf32>
    %7 = vector.shape_cast %6 : vector<1x1x8x64xf32> to vector<8x64xf32>
    %c0_5 = arith.constant 0 : index
    %c0_6 = arith.constant 0 : index
    %c0_7 = arith.constant 0 : index
    %c0_8 = arith.constant 0 : index
    %8 = vector.load %arg7[%c0_5, %c0_6, %c0_7, %c0_8] : memref<1x1x1x64xf32, #tpu.memory_space<vmem>>, vector<1x1x1x64xf32>
    %9 = vector.shape_cast %8 : vector<1x1x1x64xf32> to vector<1x64xf32>
    %10 = vector.extract_strided_slice %7 {offsets = [0, 0], sizes = [2, 64], strides = [1, 1]} : vector<8x64xf32> to vector<2x64xf32>
    %11 = arith.negf %10 : vector<2x64xf32>
    %12 = math.exp %11 : vector<2x64xf32>
    %cst_9 = arith.constant 1.000000e+00 : f32
    %13 = vector.broadcast %cst_9 : f32 to vector<2x64xf32>
    %14 = arith.addf %13, %12 : vector<2x64xf32>
    %15 = arith.divf %13, %14 : vector<2x64xf32>
    %16 = vector.extract_strided_slice %7 {offsets = [4, 0], sizes = [1, 64], strides = [1, 1]} : vector<8x64xf32> to vector<1x64xf32>
    %17 = arith.negf %16 : vector<1x64xf32>
    %18 = math.exp %17 : vector<1x64xf32>
    %cst_10 = arith.constant 1.000000e+00 : f32
    %19 = vector.broadcast %cst_10 : f32 to vector<1x64xf32>
    %20 = arith.addf %19, %18 : vector<1x64xf32>
    %21 = arith.divf %19, %20 : vector<1x64xf32>
    %c0_11 = arith.constant 0 : index
    %c0_12 = arith.constant 0 : index
    %22 = vector.load %arg4[%c0_11, %c0_12] : memref<2x64xf32, #tpu.memory_space<vmem>>, vector<2x64xf32>
    %23 = arith.addf %15, %22 : vector<2x64xf32>
    %cst_13 = arith.constant 1.250000e-01 : f32
    %24 = vector.broadcast %cst_13 : f32 to vector<2x64xf32>
    %25 = arith.mulf %23, %24 : vector<2x64xf32>
    %26 = vector.extract_strided_slice %7 {offsets = [2, 0], sizes = [1, 64], strides = [1, 1]} : vector<8x64xf32> to vector<1x64xf32>
    %27 = math.exp %26 : vector<1x64xf32>
    %28 = vector.broadcast %2 : f32 to vector<1x64xf32>
    %29 = arith.mulf %27, %28 : vector<1x64xf32>
    %30 = vector.extract_strided_slice %7 {offsets = [3, 0], sizes = [1, 64], strides = [1, 1]} : vector<8x64xf32> to vector<1x64xf32>
    %31 = math.exp %30 : vector<1x64xf32>
    %32 = vector.broadcast %5 : f32 to vector<1x64xf32>
    %33 = arith.mulf %31, %32 : vector<1x64xf32>
    %34 = vector.extract_strided_slice %25 {offsets = [0, 0], sizes = [1, 64], strides = [1, 1]} : vector<2x64xf32> to vector<1x64xf32>
    %cst_14 = arith.constant 5.000000e-01 : f32
    %35 = vector.broadcast %cst_14 : f32 to vector<1x64xf32>
    %36 = arith.mulf %35, %29 : vector<1x64xf32>
    %37 = arith.subf %34, %36 : vector<1x64xf32>
    %38 = vector.extract_strided_slice %25 {offsets = [0, 0], sizes = [1, 64], strides = [1, 1]} : vector<2x64xf32> to vector<1x64xf32>
    %cst_15 = arith.constant 5.000000e-01 : f32
    %39 = vector.broadcast %cst_15 : f32 to vector<1x64xf32>
    %40 = arith.mulf %39, %29 : vector<1x64xf32>
    %41 = arith.addf %38, %40 : vector<1x64xf32>
    %42 = vector.extract_strided_slice %25 {offsets = [1, 0], sizes = [1, 64], strides = [1, 1]} : vector<2x64xf32> to vector<1x64xf32>
    %cst_16 = arith.constant 5.000000e-01 : f32
    %43 = vector.broadcast %cst_16 : f32 to vector<1x64xf32>
    %44 = arith.mulf %43, %33 : vector<1x64xf32>
    %45 = arith.subf %42, %44 : vector<1x64xf32>
    %46 = vector.extract_strided_slice %25 {offsets = [1, 0], sizes = [1, 64], strides = [1, 1]} : vector<2x64xf32> to vector<1x64xf32>
    %cst_17 = arith.constant 5.000000e-01 : f32
    %47 = vector.broadcast %cst_17 : f32 to vector<1x64xf32>
    %48 = arith.mulf %47, %33 : vector<1x64xf32>
    %49 = arith.addf %46, %48 : vector<1x64xf32>
    %50 = arith.mulf %29, %33 : vector<1x64xf32>
    %c0_18 = arith.constant 0 : index
    %c0_19 = arith.constant 0 : index
    %c0_20 = arith.constant 0 : index
    %51 = vector.load %arg5[%c0_18, %c0_19, %c0_20] : memref<1x4x4xf32, #tpu.memory_space<vmem>>, vector<1x4x4xf32>
    %52 = vector.shape_cast %51 : vector<1x4x4xf32> to vector<4x4xf32>
    %c0_21 = arith.constant 0 : index
    %c0_22 = arith.constant 0 : index
    %c0_23 = arith.constant 0 : index
    %53 = vector.load %arg6[%c0_21, %c0_22, %c0_23] : memref<1x4x1xf32, #tpu.memory_space<vmem>>, vector<1x4x1xf32>
    %54 = vector.shape_cast %53 : vector<1x4x1xf32> to vector<4x1xf32>
    %55 = vector.extract_strided_slice %52 {offsets = [0, 0], sizes = [4, 1], strides = [1, 1]} : vector<4x4xf32> to vector<4x1xf32>
    %56 = vector.extract_strided_slice %52 {offsets = [0, 2], sizes = [4, 1], strides = [1, 1]} : vector<4x4xf32> to vector<4x1xf32>
    %cst_24 = arith.constant 5.000000e-01 : f32
    %57 = vector.broadcast %cst_24 : f32 to vector<4x1xf32>
    %58 = arith.mulf %57, %56 : vector<4x1xf32>
    %59 = arith.subf %55, %58 : vector<4x1xf32>
    %60 = vector.extract_strided_slice %52 {offsets = [0, 0], sizes = [4, 1], strides = [1, 1]} : vector<4x4xf32> to vector<4x1xf32>
    %61 = vector.extract_strided_slice %52 {offsets = [0, 2], sizes = [4, 1], strides = [1, 1]} : vector<4x4xf32> to vector<4x1xf32>
    %cst_25 = arith.constant 5.000000e-01 : f32
    %62 = vector.broadcast %cst_25 : f32 to vector<4x1xf32>
    %63 = arith.mulf %62, %61 : vector<4x1xf32>
    %64 = arith.addf %60, %63 : vector<4x1xf32>
    %65 = vector.extract_strided_slice %52 {offsets = [0, 1], sizes = [4, 1], strides = [1, 1]} : vector<4x4xf32> to vector<4x1xf32>
    %66 = vector.extract_strided_slice %52 {offsets = [0, 3], sizes = [4, 1], strides = [1, 1]} : vector<4x4xf32> to vector<4x1xf32>
    %cst_26 = arith.constant 5.000000e-01 : f32
    %67 = vector.broadcast %cst_26 : f32 to vector<4x1xf32>
    %68 = arith.mulf %67, %66 : vector<4x1xf32>
    %69 = arith.subf %65, %68 : vector<4x1xf32>
    %70 = vector.extract_strided_slice %52 {offsets = [0, 1], sizes = [4, 1], strides = [1, 1]} : vector<4x4xf32> to vector<4x1xf32>
    %71 = vector.extract_strided_slice %52 {offsets = [0, 3], sizes = [4, 1], strides = [1, 1]} : vector<4x4xf32> to vector<4x1xf32>
    %cst_27 = arith.constant 5.000000e-01 : f32
    %72 = vector.broadcast %cst_27 : f32 to vector<4x1xf32>
    %73 = arith.mulf %72, %71 : vector<4x1xf32>
    %74 = arith.addf %70, %73 : vector<4x1xf32>
    %75 = vector.extract_strided_slice %52 {offsets = [0, 2], sizes = [4, 1], strides = [1, 1]} : vector<4x4xf32> to vector<4x1xf32>
    %76 = vector.extract_strided_slice %52 {offsets = [0, 3], sizes = [4, 1], strides = [1, 1]} : vector<4x4xf32> to vector<4x1xf32>
    %77 = arith.mulf %75, %76 : vector<4x1xf32>
    %78 = vector.broadcast %41 : vector<1x64xf32> to vector<4x64xf32>
    %79 = vector.broadcast %64 : vector<4x1xf32> to vector<4x64xf32>
    %80 = arith.minimumf %78, %79 : vector<4x64xf32>
    %81 = vector.broadcast %37 : vector<1x64xf32> to vector<4x64xf32>
    %82 = vector.broadcast %59 : vector<4x1xf32> to vector<4x64xf32>
    %83 = arith.maximumf %81, %82 : vector<4x64xf32>
    %84 = arith.subf %80, %83 : vector<4x64xf32>
    %cst_28 = arith.constant 0.000000e+00 : f32
    %85 = vector.broadcast %cst_28 : f32 to vector<4x64xf32>
    %86 = arith.maximumf %84, %85 : vector<4x64xf32>
    %87 = vector.broadcast %49 : vector<1x64xf32> to vector<4x64xf32>
    %88 = vector.broadcast %74 : vector<4x1xf32> to vector<4x64xf32>
    %89 = arith.minimumf %87, %88 : vector<4x64xf32>
    %90 = vector.broadcast %45 : vector<1x64xf32> to vector<4x64xf32>
    %91 = vector.broadcast %69 : vector<4x1xf32> to vector<4x64xf32>
    %92 = arith.maximumf %90, %91 : vector<4x64xf32>
    %93 = arith.subf %89, %92 : vector<4x64xf32>
    %cst_29 = arith.constant 0.000000e+00 : f32
    %94 = vector.broadcast %cst_29 : f32 to vector<4x64xf32>
    %95 = arith.maximumf %93, %94 : vector<4x64xf32>
    %96 = arith.mulf %86, %95 : vector<4x64xf32>
    %97 = vector.broadcast %50 : vector<1x64xf32> to vector<4x64xf32>
    %98 = vector.broadcast %77 : vector<4x1xf32> to vector<4x64xf32>
    %99 = arith.addf %97, %98 : vector<4x64xf32>
    %100 = arith.subf %99, %96 : vector<4x64xf32>
    %cst_30 = arith.constant 1.000000e-16 : f32
    %101 = vector.broadcast %cst_30 : f32 to vector<4x64xf32>
    %102 = arith.addf %100, %101 : vector<4x64xf32>
    %103 = tpu.reciprocal %102 {approx = true} : vector<4x64xf32> -> vector<4x64xf32>
    %104 = arith.mulf %96, %103 : vector<4x64xf32>
    %cst_31 = arith.constant 0.000000e+00 : f32
    %105 = vector.broadcast %cst_31 : f32 to vector<4x1xf32>
    %106 = arith.cmpf ogt, %54, %105 : vector<4x1xf32>
    %cst_32 = arith.constant -1.000000e+00 : f32
    %107 = vector.shape_cast %106 : vector<4x1xi1> to vector<4x1xi1>
    %108 = vector.broadcast %107 : vector<4x1xi1> to vector<4x64xi1>
    %109 = vector.broadcast %cst_32 : f32 to vector<4x64xf32>
    %110 = arith.select %108, %104, %109 : vector<4x64xi1>, vector<4x64xf32>
    %cst_33 = arith.constant dense<0xFF800000> : vector<64xf32>
    %111 = vector.multi_reduction <maximumf>, %110, %cst_33 [0] : vector<4x64xf32> to vector<64xf32>
    %112 = vector.shape_cast %111 : vector<64xf32> to vector<1x64xf32>
    %cst_34 = arith.constant 0.699999988 : f32
    %113 = vector.broadcast %cst_34 : f32 to vector<1x64xf32>
    %114 = arith.cmpf ole, %112, %113 : vector<1x64xf32>
    %cst_35 = arith.constant 5.000000e-01 : f32
    %115 = vector.broadcast %cst_35 : f32 to vector<1x64xf32>
    %116 = arith.cmpf olt, %9, %115 : vector<1x64xf32>
    %117 = arith.andi %114, %116 : vector<1x64xi1>
    %118 = arith.extui %117 : vector<1x64xi1> to vector<1x64xi32>
    %119 = arith.sitofp %118 : vector<1x64xi32> to vector<1x64xf32>
    %120 = arith.mulf %119, %21 : vector<1x64xf32>
    %121 = arith.mulf %120, %21 : vector<1x64xf32>
    %cst_36 = arith.constant 1.000000e+00 : f32
    %122 = vector.broadcast %cst_36 : f32 to vector<1x64xf32>
    %123 = arith.subf %21, %122 : vector<1x64xf32>
    %124 = arith.mulf %123, %123 : vector<1x64xf32>
    %125 = arith.mulf %9, %124 : vector<1x64xf32>
    %126 = arith.addf %121, %125 : vector<1x64xf32>
    %c0_37 = arith.constant 0 : index
    %c0_38 = arith.constant 0 : index
    %c0_39 = arith.constant 0 : index
    %c0_40 = arith.constant 0 : index
    %127 = vector.load %arg8[%c0_37, %c0_38, %c0_39, %c0_40] : memref<1x1x1x64xf32, #tpu.memory_space<vmem>>, vector<1x1x1x64xf32>
    %128 = vector.shape_cast %127 : vector<1x1x1x64xf32> to vector<1x64xf32>
    %129 = vector.shape_cast %126 : vector<1x64xf32> to vector<1x1x1x64xf32>
    tpu.vector_store %arg8[%c0_37, %c0_38, %c0_39, %c0_40], %129 {strides = array<i32>} : memref<1x1x1x64xf32, #tpu.memory_space<vmem>>, vector<1x1x1x64xf32>,
    return
  }
  func.func @transform_0(%arg0: i32, %arg1: i32) -> (i32, i32) {
    %c0_i32 = arith.constant 0 : i32
    %c0_i32_0 = arith.constant 0 : i32
    %c0_i32_1 = arith.constant 0 : i32
    return %c0_i32, %c0_i32_0 : i32, i32
  }
  func.func @transform_1(%arg0: i32, %arg1: i32) -> (i32, i32, i32, i32) {
    %c0_i32 = arith.constant 0 : i32
    %c0_i32_0 = arith.constant 0 : i32
    %c0_i32_1 = arith.constant 0 : i32
    return %arg0, %arg1, %c0_i32, %c0_i32_0 : i32, i32, i32, i32
  }
  func.func @transform_2(%arg0: i32, %arg1: i32) -> (i32, i32) {
    %c0_i32 = arith.constant 0 : i32
    %c0_i32_0 = arith.constant 0 : i32
    %c0_i32_1 = arith.constant 0 : i32
    return %c0_i32, %c0_i32_0 : i32, i32
  }
  func.func @transform_3(%arg0: i32, %arg1: i32) -> (i32, i32, i32) {
    %c0_i32 = arith.constant 0 : i32
    %c0_i32_0 = arith.constant 0 : i32
    %c0_i32_1 = arith.constant 0 : i32
    return %arg0, %c0_i32, %c0_i32_0 : i32, i32, i32
  }
  func.func @transform_4(%arg0: i32, %arg1: i32) -> (i32, i32, i32) {
    %c0_i32 = arith.constant 0 : i32
    %c0_i32_0 = arith.constant 0 : i32
    %c0_i32_1 = arith.constant 0 : i32
    return %arg0, %c0_i32, %c0_i32_0 : i32, i32, i32
  }
  func.func @transform_5(%arg0: i32, %arg1: i32) -> (i32, i32, i32, i32) {
    %c0_i32 = arith.constant 0 : i32
    %c0_i32_0 = arith.constant 0 : i32
    %c0_i32_1 = arith.constant 0 : i32
    return %arg0, %arg1, %c0_i32, %c0_i32_0 : i32, i32, i32, i32
  }
  func.func @transform_6(%arg0: i32, %arg1: i32) -> (i32, i32, i32, i32) {
    %c0_i32 = arith.constant 0 : i32
    %c0_i32_0 = arith.constant 0 : i32
    %c0_i32_1 = arith.constant 0 : i32
    return %arg0, %arg1, %c0_i32, %c0_i32_0 : i32, i32, i32, i32
  }
}

</mosaic_0001>

<bundles_post_ra>
// kernel: _lambda_.3
= control target key start
LH: loop header
LB: loop body
LE: loop exit
PB: predicated region body
PF: predicated region fallthrough
CT: control target
= control target key end

     0   :  { %11 = vsyncpa [#allocation3], 0  ;;  %s845_s21 = smov 0   ;;  %s847_s22 = smov 0   ;;  %s953_s0 = inlined_call_operand.vmem [shape: f32[3,2], index: 0, kind: input, shape index: {}]   ;;  %s954_s1 = inlined_call_operand.vmem [shape: f32[2,3,25,16], index: 1, kind: input, shape index: {}]   ;;  %s955_s2 = inlined_call_operand.vmem [shape: f32[2,16], index: 2, kind: input, shape index: {}]   ;;  %s956_s3 = inlined_call_operand.vmem [shape: f32[2,4,4], index: 3, kind: input, shape index: {}]   ;;  %s957_s4 = inlined_call_operand.vmem [shape: f32[2,4,1], index: 4, kind: input, shape index: {}]   ;;  %s958_s5 = inlined_call_operand.vmem [shape: f32[2,3,1,16], index: 5, kind: input, shape index: {}]   ;;  %s959_s6 = inlined_call_operand.vmem [shape: f32[2,3,1,16], index: 6, kind: output, shape index: {}]  }
   0x1   :  { %s849_s23 = smov 0   ;;  %s851_s24 = smov 0  }
   0x2   :  { %s853_s25 = smov 0  }
   0x3 LB: > { %s653_s26 = sadd.s32 4294967295, %s800_s25   ;;  %s26_s27 = sadd.s32 1, %s792_s23  ;;  %s800_s25 = sphi %s853_s25, %s17_s25   ;;  %s796_s24 = sphi %s851_s24, %s965_s24   ;;  %s792_s23 = sphi %s849_s23, %s964_s23   ;;  %s788_s22 = sphi %s847_s22, %s963_s22   ;;  %s784_s21 = sphi %s845_s21, %s962_s21  }
   0x4   : > { %p27_p0 = scmp.ge.s32.totalorder %s26_s27, 3  ;;  %s29_s28 = sadd.s32 1, %s796_s24 }
   0x5   : > { %p655_p1 = scmp.ge.s32.totalorder %s800_s25, 1  ;;  %p212_p2 = scmp.lt.s32.totalorder %s800_s25, 7 }
   0x6   : > { %s967_s27 = smov (%p27_p0, %s26_s27), 0  ;;  %s969_s28 = smov (!%p27_p0, %s29_s28), %s796_s24 }
   0x7   : > { %p878_p3 = pnand %p655_p1, %p212_p2  ;;  %p31_p4 = scmp.ge.s32.totalorder %s969_s28, 2 }
   0x8   : > { %p882_p5 = scmp.eq.s32.totalorder %s653_s26, 0  ;;  %s225_s9 = sshll.u32 %s953_s0, 4  ;;  %s226_s9 = int_to_ptr.vmem [resolvable:$true] %s225_s9 }
   0x9   : > { %p676_p6 = pneg %p878_p3  ;;  %s971_s28 = smov (%p31_p4, %s969_s28), 0 }
   0xa   : > { %s743_s10 = scalar_lea.vmem %s226_s9, 64  ;;  %p751_p12 = scmp.lt.s32.totalorder %s226_s9, %s226_s9 }
   0xb   : > { %p677_p7 = pnand %p882_p5, %p676_p6  ;;  %p744_p8 = scmp.ne.s32.totalorder %s226_s9, %s743_s10 }
   0xc   : > { %p752_p13 = scmp.lt.s32.totalorder %s743_s10, %s743_s10 }
   0xd   : > { %p745_p9 = pneg %p677_p7 }
   0xe   : > { %p753_p0 = por %p752_p13, %p751_p12 }
   0xf   : > { %p746_p10 = pnand %p745_p9, %p744_p8 }
  0x11   : > { %p747_p11 = pneg %p746_p10 }
  0x13   : > { %p754_p1 = pnand %p753_p0, %p747_p11 }
  0x15   : > { %757 = shalt.err (!%p754_p1)
}
  0x16   : > { %s802_s11 = smov [#allocation2]   ;;  %277 = sbr.rel (%p878_p3) target bundleno = 343 (0x157), region = 44 }
  0x17   : > { %679 = dma.vmem_to_smem (!%p677_p7), %s226_s9, 64, %s802_s11, [#allocation3]  }
  0x1d   : > { %779 = dma.done.wait (%p882_p5), [#allocation3], 64  }
  0x1e   : > { %781 = vsyncadd (%p882_p5), [#allocation3], 4294967232 }
  0x1f   : > { %283 = sfence }
  0x20   : > { %p329_p2 = scmp.lt.s32.totalorder %s788_s22, 1  ;;  %v803_v0 = vmov 1   ;;  %v804_v1 = vmov 0   ;;  %s805_s16 = smov 126   ;;  %v807_v11 = vmov 2   ;;  %v413_v24 = vlaneseq }
  0x21   : > { %731 = vset.pattern.permute.xlu0 %v803_v0  ;;  %730 = vset.pattern.permute.xlu1 %v804_v1  ;;  %s806_s17 = smov 127   ;;  %p331_p3 = scmp.lt.s32.totalorder %s784_s21, 2  ;;  %v374_v22 = vld [vmem:[%s955_s2] sm:$0x3]  ;;  %vm477_vm2 = vcmask 125952   ;;  %vm516_vm6 = vcmask 122880  }
  0x22   : > { %s973_s22 = smov (!%p329_p2, %s788_s22), 1  ;;  %v414_v28 = vshrl.u32 %v413_v24, 7 }
  0x23   : > { %s662_s12 = sshll.u32 %s973_s22, 2  ;;  %s670_s29 = smul.u32 12, %s973_s22 }
  0x24   : > { %s341_s15 = scalar_lea.vmem %s956_s3, %s662_s12  ;;  %s345_s20 = scalar_lea.vmem %s957_s4, %s662_s12  ;;  %v415_v33 = vsub.s32 0, %v414_v28  ;;  %v437_v36 = vsub.s32 1, %v414_v28  ;;  %v458_v47 = vsub.s32 2, %v414_v28 }
  0x25   : > { %v399_v2 = vld [vmem:[%s341_s15] sm:$0xf]  ;;  %s914_s26 = scalar_select %p331_p3, %s784_s21, 2 }
  0x26   : > { %v401_v3 = vmul.f32 0.5, %v399_v2  ;;  %v400_v4 = vld [vmem:[%s345_s20] sm:$0xf]  ;;  %s664_s12 = sshll.u32 %s784_s21, 7  ;;  %s671_s21 = smul.u32 3, %s973_s22 }
  0x27   : > { %vm470_vm0 = vcmp.gt.f32.partialorder %v400_v4, 0.0  ;;  %s660_s30 = sshll.u32 %s914_s26, 2  ;;  %s363_s13 = sadd.s32 1, %s664_s12 }
  0x28   : > { %403 = vrot.lane.b32.xlu0 %v401_v3, %s805_s16  ;;  %v471_v8 = vsel %vm470_vm0, 1, %v804_v1  ;;  %s335_s7 = sadd.s32 %s670_s29, %s660_s30  ;;  %s361_s14 = sld [smem:[#allocation2 + %s664_s12]] }
  0x29   : > { %s661_s8 = sshll.u32 %s335_s7, 3  ;;  %s364_s15 = sld [smem:[#allocation2 + %s363_s13]] }
  0x2a   : > { %s337_s11 = scalar_lea.vmem %s954_s1, %s661_s8  ;;  %s351_s20 = sadd.s32 %s671_s21, %s914_s26 }
  0x2b   : > { %v366_v12 = vld [vmem:[%s337_s11] sm:$0xff]  ;;  %s352_s7 = scalar_lea.vmem %s958_s5, %s351_s20  ;;  %s359_s8 = scalar_lea.vmem %s959_s6, %s351_s20 }
  0x2c   : > { %409 = vrot.lane.b32.xlu0 %v399_v2, %s806_s17  ;;  %v665_v13 = vmul.f32 -1.442695, %v366_v12  ;;  %v377_v14 = vmul.f32 1.442695, %v366_v12 }
  0x2e   : > { %735 = vpow2.f32 %v665_v13  ;;  %s362_s16 = smul.f32 0.015625, %s361_s14 }
  0x2f   : > { %737 = vpow2.f32 %v377_v14  ;;  %s365_s17 = smul.f32 0.015625, %s364_s15 }
  0x30   : > { %v379_v18 = vstv %s362_s16 }
  0x31   : > { %v381_v19 = vstv %s365_s17 }
  0x38   : > { %v736_v15 = vpop.eup %735 }
  0x39   : > { %v371_v16 = vadd.f32 1.0, %v736_v15  ;;  %v738_v17 = vpop.eup %737  ;;  %v367_v15 = vld [vmem:[%s352_s7] sm:$0x1] }
  0x3a   : > { %v380_v20 = vmul.f32 %v738_v17, %v379_v18  ;;  %v382_v23 = vmul.f32 %v738_v17, %v381_v19  ;;  %vm486_vm3 = vcmp.lt.f32.partialorder %v367_v15, 0.5 }
  0x3b   : > { %739 = vrcp.f32 %v371_v16 }
  0x3c   : > { %v383_v26 = vmul.f32 0.5, %v380_v20  ;;  %v389_v27 = vmul.f32 0.5, %v382_v23  ;;  %v396_v40 = vrot.slane %v382_v23, 1 }
  0x3e   : > { %v385_v30 = vrot.slane %v383_v26, 2  ;;  %v391_v31 = vrot.slane %v389_v27, 2  ;;  %v398_v48 = vmul.f32 %v396_v40, %v380_v20 }
  0x40   : > { %v459_v54 = vrot.slane %v398_v48, %v458_v47 }
  0x45   : > { %v922_v21 = vpop.eup %739 }
  0x46   : > { %v375_v25 = vadd.f32 %v922_v21, %v374_v22  ;;  %v667_v3 = vadd.f32 -1.0, %v922_v21  ;;  %v491_v19 = vrot.slane %v922_v21, 4  ;;  %v809_v22 = vmov 0.0  }
  0x48   : > { %v376_v29 = vmul.f32 0.25, %v375_v25 }
  0x4a   : > { %v387_v32 = vsub.f32 %v376_v29, %v385_v30  ;;  %v388_v35 = vadd.f32 %v385_v30, %v376_v29  ;;  %v394_v37 = vadd.f32 %v391_v31, %v376_v29  ;;  %v393_v39 = vsub.f32 %v376_v29, %v391_v31 }
  0x4c   : > { %v426_v38 = vrot.slane %v387_v32, %v415_v33  ;;  %v416_v41 = vrot.slane %v388_v35, %v415_v33  ;;  %v438_v43 = vrot.slane %v394_v37, %v437_v36  ;;  %v447_v45 = vrot.slane %v393_v39, %v437_v36 }
  0x9a   : > { %v404_v5 = vpop.permute.xlu0 %403 }
  0x9b   : > { %v407_v6 = vadd.f32 %v404_v5, %v399_v2  ;;  %v406_v7 = vsub.f32 %v399_v2, %v404_v5 }
  0x9d   : > { %440 = vperm.xlu0 %731, %v407_v6   ;;  %419 = vperm.xlu1 %730, %v407_v6  }
  0x9e   : > { %v410_v9 = vpop.permute.xlu0 %409 }
  0x9f   : > { %v412_v10 = vmul.f32 %v410_v9, %v399_v2 }
  0xa1   : > { %429 = vperm.xlu1 %730, %v406_v7   ;;  %734 = vset.pattern.permute.xlu0 %v804_v1  ;;  %v808_v1 = vmov 1966171168  }
  0xa2   : > { %473 = vperm.xlu0 %734, %v471_v8   ;;  %v500_v2 = vunpack.c.l.s4 %v808_v1  ;;  %v496_v8 = vmul.f32 %v667_v3, %v667_v3 }
  0xa4   : > { %v501_v6 = vunpack.c.0.s8 %v500_v2  ;;  %v498_v12 = vcombine.high %v496_v8, %v496_v8 }
  0xa5   : > { %732 = vset.pattern.permute.xlu1 %v803_v0 }
  0xa6   : > { %449 = vperm.xlu1 %732, %v406_v7  }
  0xaa   : > { %733 = vset.pattern.permute.xlu1 %v807_v11  ;;  %v504_v11 = vsub.s32 %v501_v6, %v414_v28 }
  0xab   : > { %462 = vperm.xlu1 %733, %v412_v10  }
  0xac   : > { %v505_v16 = vrot.slane %v498_v12, %v504_v11 }
  0xae   : > { %v512_v20 = vrot.slane %v505_v16, %v504_v11 }
  0xb0   : > { %v514_v25 = vmul.f32 %v512_v20, %v367_v15 }
 0x11c   : > { %v420_v34 = vpop.permute.xlu1 %419  ;;  %v441_v46 = vpop.permute.xlu0 %440 }
 0x11d   : > { %v422_v49 = vmin.f32 %v416_v41, %v420_v34  ;;  %v443_v51 = vmin.f32 %v438_v43, %v441_v46 }
 0x120   : > { %v430_v42 = vpop.permute.xlu1 %429 }
 0x121   : > { %v432_v44 = vmax.f32 %v426_v38, %v430_v42  ;;  %v474_v63 = vpop.permute.xlu0 %473 }
 0x122   : > { %vm475_vm1 = vcmp.eq.s32.totalorder %v474_v63, 1 }
 0x123   : > { %v433_v52 = vsub.f32 %v422_v49, %v432_v44 }
 0x125   : > { %v450_v50 = vpop.permute.xlu1 %449  ;;  %v434_v56 = vmax.f32 %v433_v52, 0.0 }
 0x126   : > { %v452_v53 = vmax.f32 %v447_v45, %v450_v50 }
 0x128   : > { %v453_v55 = vsub.f32 %v443_v51, %v452_v53 }
 0x12a   : > { %v454_v57 = vmax.f32 %v453_v55, 0.0  ;;  %v463_v58 = vpop.permute.xlu1 %462 }
 0x12b   : > { %v465_v59 = vadd.f32 %v463_v58, %v459_v54 }
 0x12c   : > { %v455_v60 = vmul.f32 %v454_v57, %v434_v56 }
 0x12e   : > { %v466_v61 = vsub.f32 %v465_v59, %v455_v60 }
 0x130   : > { %v467_v62 = vadd.f32 1e-16, %v466_v61 }
 0x132   : > { %741 = vrcp.f32 %v467_v62 }
 0x13c   : > { %v742_v0 = vpop.eup %741 }
 0x13d   : > { %v469_v4 = vmul.f32 %v742_v0, %v455_v60 }
 0x13f   : > { %v476_v5 = vsel %vm475_vm1, %v469_v4, -1.0 }
 0x140   : > { %v478_v7 = vsel %vm477_vm2, %v476_v5, -inf }
 0x141   : > { %v479_v9 = vrot.slane %v478_v7, 4 }
 0x143   : > { %v480_v10 = vmax.f32 %v478_v7, %v479_v9 }
 0x145   : > { %v481_v13 = vrot.slane %v480_v10, 2 }
 0x147   : > { %v482_v14 = vmax.f32 %v480_v10, %v481_v13 }
 0x149   : > { %v483_v17 = vrot.slane %v482_v14, 1 }
 0x14b   : > { %v484_v18 = vmax.f32 %v482_v14, %v483_v17 }
 0x14d   : > { %vm485_vm4 = vcmp.le.f32.partialorder %v484_v18, 0.7 }
 0x14e   : > { %vm487_vm5 = vmand %vm485_vm4, %vm486_vm3 }
 0x14f   : > { %v666_v23 = vsel %vm487_vm5, 1.0, %v809_v22 }
 0x150   : > { %v493_v24 = vmul.f32 %v666_v23, %v491_v19 }
 0x152   : > { %v494_v26 = vmul.f32 %v493_v24, %v491_v19 }
 0x154   : > { %v515_v27 = vadd.f32 %v514_v25, %v494_v26 }
 0x156   : > { %517 = vst.msk [vmem:[%s359_s8] sm:$0x1] %vm516_vm6, %v515_v27 }
 0x157 PF: > { %s17_s25 = sadd.s32 1, %s800_s25   ;;  %s962_s21 = smov %s792_s23 }
 0x158   : > { %p14_p4 = scmp.ge.s32.totalorder %s17_s25, 8   ;;  %s963_s22 = smov %s796_s24 }
 0x159   : > { %s964_s23 = smov %s967_s27  ;;  %s965_s24 = smov %s971_s28 }
 0x15a   :  { %16 = sbr.rel (!%p14_p4) target bundleno = 3 (0x3), region = 88 }
 0x161   :  { %543 = vsyncpa [#allocation3], 1 }
 0x162   :  { %545 = vsyncpa [#allocation3 + $0x1], 1 }

// kernel: _lambda_.2
= control target key start
LH: loop header
LB: loop body
LE: loop exit
PB: predicated region body
PF: predicated region fallthrough
CT: control target
= control target key end

     0   :  { %11 = vsyncpa [#allocation3], 0  ;;  %s845_s21 = smov 0   ;;  %s847_s22 = smov 0   ;;  %s953_s0 = inlined_call_operand.vmem [shape: f32[3,2], index: 0, kind: input, shape index: {}]   ;;  %s954_s1 = inlined_call_operand.vmem [shape: f32[2,3,25,64], index: 1, kind: input, shape index: {}]   ;;  %s955_s2 = inlined_call_operand.vmem [shape: f32[2,64], index: 2, kind: input, shape index: {}]   ;;  %s956_s3 = inlined_call_operand.vmem [shape: f32[2,4,4], index: 3, kind: input, shape index: {}]   ;;  %s957_s4 = inlined_call_operand.vmem [shape: f32[2,4,1], index: 4, kind: input, shape index: {}]   ;;  %s958_s5 = inlined_call_operand.vmem [shape: f32[2,3,1,64], index: 5, kind: input, shape index: {}]   ;;  %s959_s6 = inlined_call_operand.vmem [shape: f32[2,3,1,64], index: 6, kind: output, shape index: {}]  }
   0x1   :  { %s849_s23 = smov 0   ;;  %s851_s24 = smov 0  }
   0x2   :  { %s853_s25 = smov 0  }
   0x3 LB: > { %s653_s26 = sadd.s32 4294967295, %s800_s25   ;;  %s26_s27 = sadd.s32 1, %s792_s23  ;;  %s800_s25 = sphi %s853_s25, %s17_s25   ;;  %s796_s24 = sphi %s851_s24, %s965_s24   ;;  %s792_s23 = sphi %s849_s23, %s964_s23   ;;  %s788_s22 = sphi %s847_s22, %s963_s22   ;;  %s784_s21 = sphi %s845_s21, %s962_s21  }
   0x4   : > { %p27_p0 = scmp.ge.s32.totalorder %s26_s27, 3  ;;  %s29_s28 = sadd.s32 1, %s796_s24 }
   0x5   : > { %p655_p1 = scmp.ge.s32.totalorder %s800_s25, 1  ;;  %p212_p2 = scmp.lt.s32.totalorder %s800_s25, 7 }
   0x6   : > { %s967_s27 = smov (%p27_p0, %s26_s27), 0  ;;  %s969_s28 = smov (!%p27_p0, %s29_s28), %s796_s24 }
   0x7   : > { %p878_p3 = pnand %p655_p1, %p212_p2  ;;  %p31_p4 = scmp.ge.s32.totalorder %s969_s28, 2 }
   0x8   : > { %p882_p5 = scmp.eq.s32.totalorder %s653_s26, 0  ;;  %s225_s9 = sshll.u32 %s953_s0, 4  ;;  %s226_s9 = int_to_ptr.vmem [resolvable:$true] %s225_s9 }
   0x9   : > { %p676_p6 = pneg %p878_p3  ;;  %s971_s28 = smov (%p31_p4, %s969_s28), 0 }
   0xa   : > { %s743_s10 = scalar_lea.vmem %s226_s9, 64  ;;  %p751_p12 = scmp.lt.s32.totalorder %s226_s9, %s226_s9 }
   0xb   : > { %p677_p7 = pnand %p882_p5, %p676_p6  ;;  %p744_p8 = scmp.ne.s32.totalorder %s226_s9, %s743_s10 }
   0xc   : > { %p752_p13 = scmp.lt.s32.totalorder %s743_s10, %s743_s10 }
   0xd   : > { %p745_p9 = pneg %p677_p7 }
   0xe   : > { %p753_p0 = por %p752_p13, %p751_p12 }
   0xf   : > { %p746_p10 = pnand %p745_p9, %p744_p8 }
  0x11   : > { %p747_p11 = pneg %p746_p10 }
  0x13   : > { %p754_p1 = pnand %p753_p0, %p747_p11 }
  0x15   : > { %757 = shalt.err (!%p754_p1)
}
  0x16   : > { %s802_s11 = smov [#allocation2]   ;;  %277 = sbr.rel (%p878_p3) target bundleno = 343 (0x157), region = 44 }
  0x17   : > { %679 = dma.vmem_to_smem (!%p677_p7), %s226_s9, 64, %s802_s11, [#allocation3]  }
  0x1d   : > { %779 = dma.done.wait (%p882_p5), [#allocation3], 64  }
  0x1e   : > { %781 = vsyncadd (%p882_p5), [#allocation3], 4294967232 }
  0x1f   : > { %283 = sfence }
  0x20   : > { %p329_p2 = scmp.lt.s32.totalorder %s788_s22, 1  ;;  %v803_v0 = vmov 1   ;;  %v804_v1 = vmov 0   ;;  %s805_s16 = smov 126   ;;  %v807_v11 = vmov 2   ;;  %v413_v24 = vlaneseq }
  0x21   : > { %731 = vset.pattern.permute.xlu0 %v803_v0  ;;  %730 = vset.pattern.permute.xlu1 %v804_v1  ;;  %s806_s17 = smov 127   ;;  %p331_p3 = scmp.lt.s32.totalorder %s784_s21, 2  ;;  %v374_v22 = vld [vmem:[%s955_s2] sm:$0x3]  ;;  %vm477_vm2 = vcmask 519168   ;;  %vm516_vm6 = vcmask 516096  }
  0x22   : > { %s973_s22 = smov (!%p329_p2, %s788_s22), 1  ;;  %v414_v28 = vshrl.u32 %v413_v24, 7 }
  0x23   : > { %s662_s12 = sshll.u32 %s973_s22, 2  ;;  %s670_s29 = smul.u32 12, %s973_s22 }
  0x24   : > { %s341_s15 = scalar_lea.vmem %s956_s3, %s662_s12  ;;  %s345_s20 = scalar_lea.vmem %s957_s4, %s662_s12  ;;  %v415_v33 = vsub.s32 0, %v414_v28  ;;  %v437_v36 = vsub.s32 1, %v414_v28  ;;  %v458_v47 = vsub.s32 2, %v414_v28 }
  0x25   : > { %v399_v2 = vld [vmem:[%s341_s15] sm:$0xf]  ;;  %s914_s26 = scalar_select %p331_p3, %s784_s21, 2 }
  0x26   : > { %v401_v3 = vmul.f32 0.5, %v399_v2  ;;  %v400_v4 = vld [vmem:[%s345_s20] sm:$0xf]  ;;  %s664_s12 = sshll.u32 %s784_s21, 7  ;;  %s671_s21 = smul.u32 3, %s973_s22 }
  0x27   : > { %vm470_vm0 = vcmp.gt.f32.partialorder %v400_v4, 0.0  ;;  %s660_s30 = sshll.u32 %s914_s26, 2  ;;  %s363_s13 = sadd.s32 1, %s664_s12 }
  0x28   : > { %403 = vrot.lane.b32.xlu0 %v401_v3, %s805_s16  ;;  %v471_v8 = vsel %vm470_vm0, 1, %v804_v1  ;;  %s335_s7 = sadd.s32 %s670_s29, %s660_s30  ;;  %s361_s14 = sld [smem:[#allocation2 + %s664_s12]] }
  0x29   : > { %s661_s8 = sshll.u32 %s335_s7, 3  ;;  %s364_s15 = sld [smem:[#allocation2 + %s363_s13]] }
  0x2a   : > { %s337_s11 = scalar_lea.vmem %s954_s1, %s661_s8  ;;  %s351_s20 = sadd.s32 %s671_s21, %s914_s26 }
  0x2b   : > { %v366_v12 = vld [vmem:[%s337_s11] sm:$0xff]  ;;  %s352_s7 = scalar_lea.vmem %s958_s5, %s351_s20  ;;  %s359_s8 = scalar_lea.vmem %s959_s6, %s351_s20 }
  0x2c   : > { %409 = vrot.lane.b32.xlu0 %v399_v2, %s806_s17  ;;  %v665_v13 = vmul.f32 -1.442695, %v366_v12  ;;  %v377_v14 = vmul.f32 1.442695, %v366_v12 }
  0x2e   : > { %735 = vpow2.f32 %v665_v13  ;;  %s362_s16 = smul.f32 0.015625, %s361_s14 }
  0x2f   : > { %737 = vpow2.f32 %v377_v14  ;;  %s365_s17 = smul.f32 0.015625, %s364_s15 }
  0x30   : > { %v379_v18 = vstv %s362_s16 }
  0x31   : > { %v381_v19 = vstv %s365_s17 }
  0x38   : > { %v736_v15 = vpop.eup %735 }
  0x39   : > { %v371_v16 = vadd.f32 1.0, %v736_v15  ;;  %v738_v17 = vpop.eup %737  ;;  %v367_v15 = vld [vmem:[%s352_s7] sm:$0x1] }
  0x3a   : > { %v380_v20 = vmul.f32 %v738_v17, %v379_v18  ;;  %v382_v23 = vmul.f32 %v738_v17, %v381_v19  ;;  %vm486_vm3 = vcmp.lt.f32.partialorder %v367_v15, 0.5 }
  0x3b   : > { %739 = vrcp.f32 %v371_v16 }
  0x3c   : > { %v383_v26 = vmul.f32 0.5, %v380_v20  ;;  %v389_v27 = vmul.f32 0.5, %v382_v23  ;;  %v396_v40 = vrot.slane %v382_v23, 1 }
  0x3e   : > { %v385_v30 = vrot.slane %v383_v26, 2  ;;  %v391_v31 = vrot.slane %v389_v27, 2  ;;  %v398_v48 = vmul.f32 %v396_v40, %v380_v20 }
  0x40   : > { %v459_v54 = vrot.slane %v398_v48, %v458_v47 }
  0x45   : > { %v922_v21 = vpop.eup %739 }
  0x46   : > { %v375_v25 = vadd.f32 %v922_v21, %v374_v22  ;;  %v667_v3 = vadd.f32 -1.0, %v922_v21  ;;  %v491_v19 = vrot.slane %v922_v21, 4  ;;  %v809_v22 = vmov 0.0  }
  0x48   : > { %v376_v29 = vmul.f32 0.125, %v375_v25 }
  0x4a   : > { %v387_v32 = vsub.f32 %v376_v29, %v385_v30  ;;  %v388_v35 = vadd.f32 %v385_v30, %v376_v29  ;;  %v394_v37 = vadd.f32 %v391_v31, %v376_v29  ;;  %v393_v39 = vsub.f32 %v376_v29, %v391_v31 }
  0x4c   : > { %v426_v38 = vrot.slane %v387_v32, %v415_v33  ;;  %v416_v41 = vrot.slane %v388_v35, %v415_v33  ;;  %v438_v43 = vrot.slane %v394_v37, %v437_v36  ;;  %v447_v45 = vrot.slane %v393_v39, %v437_v36 }
  0x9a   : > { %v404_v5 = vpop.permute.xlu0 %403 }
  0x9b   : > { %v407_v6 = vadd.f32 %v404_v5, %v399_v2  ;;  %v406_v7 = vsub.f32 %v399_v2, %v404_v5 }
  0x9d   : > { %440 = vperm.xlu0 %731, %v407_v6   ;;  %419 = vperm.xlu1 %730, %v407_v6  }
  0x9e   : > { %v410_v9 = vpop.permute.xlu0 %409 }
  0x9f   : > { %v412_v10 = vmul.f32 %v410_v9, %v399_v2 }
  0xa1   : > { %429 = vperm.xlu1 %730, %v406_v7   ;;  %734 = vset.pattern.permute.xlu0 %v804_v1  ;;  %v808_v1 = vmov 1966171168  }
  0xa2   : > { %473 = vperm.xlu0 %734, %v471_v8   ;;  %v500_v2 = vunpack.c.l.s4 %v808_v1  ;;  %v496_v8 = vmul.f32 %v667_v3, %v667_v3 }
  0xa4   : > { %v501_v6 = vunpack.c.0.s8 %v500_v2  ;;  %v498_v12 = vcombine.high %v496_v8, %v496_v8 }
  0xa5   : > { %732 = vset.pattern.permute.xlu1 %v803_v0 }
  0xa6   : > { %449 = vperm.xlu1 %732, %v406_v7  }
  0xaa   : > { %733 = vset.pattern.permute.xlu1 %v807_v11  ;;  %v504_v11 = vsub.s32 %v501_v6, %v414_v28 }
  0xab   : > { %462 = vperm.xlu1 %733, %v412_v10  }
  0xac   : > { %v505_v16 = vrot.slane %v498_v12, %v504_v11 }
  0xae   : > { %v512_v20 = vrot.slane %v505_v16, %v504_v11 }
  0xb0   : > { %v514_v25 = vmul.f32 %v512_v20, %v367_v15 }
 0x11c   : > { %v420_v34 = vpop.permute.xlu1 %419  ;;  %v441_v46 = vpop.permute.xlu0 %440 }
 0x11d   : > { %v422_v49 = vmin.f32 %v416_v41, %v420_v34  ;;  %v443_v51 = vmin.f32 %v438_v43, %v441_v46 }
 0x120   : > { %v430_v42 = vpop.permute.xlu1 %429 }
 0x121   : > { %v432_v44 = vmax.f32 %v426_v38, %v430_v42  ;;  %v474_v63 = vpop.permute.xlu0 %473 }
 0x122   : > { %vm475_vm1 = vcmp.eq.s32.totalorder %v474_v63, 1 }
 0x123   : > { %v433_v52 = vsub.f32 %v422_v49, %v432_v44 }
 0x125   : > { %v450_v50 = vpop.permute.xlu1 %449  ;;  %v434_v56 = vmax.f32 %v433_v52, 0.0 }
 0x126   : > { %v452_v53 = vmax.f32 %v447_v45, %v450_v50 }
 0x128   : > { %v453_v55 = vsub.f32 %v443_v51, %v452_v53 }
 0x12a   : > { %v454_v57 = vmax.f32 %v453_v55, 0.0  ;;  %v463_v58 = vpop.permute.xlu1 %462 }
 0x12b   : > { %v465_v59 = vadd.f32 %v463_v58, %v459_v54 }
 0x12c   : > { %v455_v60 = vmul.f32 %v454_v57, %v434_v56 }
 0x12e   : > { %v466_v61 = vsub.f32 %v465_v59, %v455_v60 }
 0x130   : > { %v467_v62 = vadd.f32 1e-16, %v466_v61 }
 0x132   : > { %741 = vrcp.f32 %v467_v62 }
 0x13c   : > { %v742_v0 = vpop.eup %741 }
 0x13d   : > { %v469_v4 = vmul.f32 %v742_v0, %v455_v60 }
 0x13f   : > { %v476_v5 = vsel %vm475_vm1, %v469_v4, -1.0 }
 0x140   : > { %v478_v7 = vsel %vm477_vm2, %v476_v5, -inf }
 0x141   : > { %v479_v9 = vrot.slane %v478_v7, 4 }
 0x143   : > { %v480_v10 = vmax.f32 %v478_v7, %v479_v9 }
 0x145   : > { %v481_v13 = vrot.slane %v480_v10, 2 }
 0x147   : > { %v482_v14 = vmax.f32 %v480_v10, %v481_v13 }
 0x149   : > { %v483_v17 = vrot.slane %v482_v14, 1 }
 0x14b   : > { %v484_v18 = vmax.f32 %v482_v14, %v483_v17 }
 0x14d   : > { %vm485_vm4 = vcmp.le.f32.partialorder %v484_v18, 0.7 }
 0x14e   : > { %vm487_vm5 = vmand %vm485_vm4, %vm486_vm3 }
 0x14f   : > { %v666_v23 = vsel %vm487_vm5, 1.0, %v809_v22 }
 0x150   : > { %v493_v24 = vmul.f32 %v666_v23, %v491_v19 }
 0x152   : > { %v494_v26 = vmul.f32 %v493_v24, %v491_v19 }
 0x154   : > { %v515_v27 = vadd.f32 %v514_v25, %v494_v26 }
 0x156   : > { %517 = vst.msk [vmem:[%s359_s8] sm:$0x1] %vm516_vm6, %v515_v27 }
 0x157 PF: > { %s17_s25 = sadd.s32 1, %s800_s25   ;;  %s962_s21 = smov %s792_s23 }
 0x158   : > { %p14_p4 = scmp.ge.s32.totalorder %s17_s25, 8   ;;  %s963_s22 = smov %s796_s24 }
 0x159   : > { %s964_s23 = smov %s967_s27  ;;  %s965_s24 = smov %s971_s28 }
 0x15a   :  { %16 = sbr.rel (!%p14_p4) target bundleno = 3 (0x3), region = 88 }
 0x161   :  { %543 = vsyncpa [#allocation3], 1 }
 0x162   :  { %545 = vsyncpa [#allocation3 + $0x1], 1 }

</bundles_post_ra>
